<compile_context>
chip_gen: v5e
topology: v5e:2x2
jax: 0.10.0
libtpu: 0.0.40
codegen_flags: <defaults>
</compile_context>

<pallas_src>
import jax
import jax.numpy as jnp
from jax.experimental import pallas as pl
from jax.experimental.pallas import tpu as pltpu

LANE = 128  # TPU lane width


def _round_up(x, m):
    return (x + m - 1) // m * m


def mlp_kernel(x_ref, w1_ref, b1_ref, w2_ref, b2_ref, o_ref):
    # Cast the f32 batch tile to the matmul dtype on the VPU (free under the
    # tile's DMA); avoids a separate wrapper-side cast pass over x in HBM.
    x = x_ref[...].astype(w1_ref.dtype)
    # Hidden layer on the MXU, f32 accumulation; bias + ReLU in f32.
    h = jnp.dot(x, w1_ref[...], preferred_element_type=jnp.float32)
    h = jnp.maximum(h + b1_ref[...], 0.0)
    # Final layer: cast back to the matmul dtype for the MXU, accumulate in f32.
    # TODO(synk): keep h in f32 for the 2nd matmul if bit-tighter parity with
    # the f32 PyTorch reference is ever required.
    h = h.astype(w2_ref.dtype)
    o_ref[...] = (jnp.dot(h, w2_ref[...], preferred_element_type=jnp.float32)
                  + b2_ref[...]).astype(o_ref.dtype)


def _is_tpu():
    try:
        return "tpu" in jax.devices()[0].platform.lower()
    except Exception:
        return False


def _default_matmul_dtype():
    # bf16 inputs + f32 accumulation on every TPU generation (the MXU is
    # bf16-native on v5e too; f32 inputs cost multiple passes and 2x HBM bytes).
    return jnp.bfloat16 if _is_tpu() else jnp.float32


def _num_tensorcores():
    """TensorCores per chip: 2 on v7x and megacore (v4/v5p), else 1."""
    try:
        kind = jax.devices()[0].device_kind.lower()
    except Exception:
        return 1
    if any(tag in kind for tag in ("v7", "7x", "v4", "v5p")):
        return 2
    return 1


def _vmem_capacity_bytes():
    try:
        return int(pltpu.get_tpu_info().vmem_capacity_bytes)
    except Exception:
        return 64 * 1024 * 1024  # conservative (v7x per-TC) fallback


def _choose_tiling(B, Din, Hpad, Dpad, w_bytes, out_bytes, vmem_budget,
                   num_cores):
    """Pick (tile_m, grid_steps): fewest steps (1 per TC) that fit VMEM."""
    # Resident (grid-invariant) operands; Pallas double-buffers every input by
    # default, so count weights/biases twice.
    # TODO(synk): pin resident weights to pipeline_mode=pl.Buffered(1) once
    # single-buffered invariant inputs are exercised in this jax version; then
    # drop the 2x here.
    resident = 2 * ((Din * Hpad + Hpad * Dpad) * w_bytes + (Hpad + Dpad) * 4)
    # Per batch-row VMEM: double-buffered f32 x tile + double-buffered out tile
    # + in-kernel intermediates (x cast, h f32, h cast).
    per_row = (2 * Din * 4 + 2 * Dpad * out_bytes
               + Din * w_bytes + Hpad * 4 + Hpad * w_bytes)
    max_tile = max(8, (vmem_budget - resident) // per_row)

    steps = num_cores
    while True:
        tile = -(-B // steps)                      # ceil(B / steps)
        if steps > 1:
            tile = _round_up(tile, 8)              # blocked dim: f32 sublanes
        if tile <= max_tile or tile <= 8:
            break
        steps += num_cores                         # keep the grid TC-balanced
    return int(tile), int(steps)


def ournet_forward(x, w1, b1, w2, b2, *, tile_m=None, matmul_dtype=None,
                   out_dtype=jnp.float32):
    """Fused forward pass of ournet (depth=2).

    x  : [B, Din]   float32
    w1 : [Din, H]   float32   (PyTorch hidden weight, transposed)
    b1 : [1, H]     float32
    w2 : [H, Dout]  float32   (PyTorch final weight, transposed)
    b2 : [1, Dout]  float32
    """
    B, Din = x.shape
    H = w1.shape[1]
    Dout = w2.shape[1]

    if matmul_dtype is None:
        matmul_dtype = _default_matmul_dtype()
    w_bytes = jnp.dtype(matmul_dtype).itemsize
    out_bytes = jnp.dtype(out_dtype).itemsize

    # Lane-dense layouts: pad the hidden dim and the output dim to multiples of
    # 128 lanes (zero pads are exact: relu(0+0)=0 and zero rows of w2 add 0).
    Hpad = max(LANE, _round_up(H, LANE))
    Dpad = max(LANE, _round_up(Dout, LANE))
    if Hpad != H:
        w1 = jnp.pad(w1, ((0, 0), (0, Hpad - H)))
        b1 = jnp.pad(b1, ((0, 0), (0, Hpad - H)))
        w2 = jnp.pad(w2, ((0, Hpad - H), (0, 0)))
    if Dpad != Dout:
        w2 = jnp.pad(w2, ((0, 0), (0, Dpad - Dout)))
        b2 = jnp.pad(b2, ((0, 0), (0, Dpad - Dout)))

    # VMEM budgeting (v7x: 64 MiB, v5e/v6e: 128 MiB physical). Use most of the
    # scoped limit for tiles; only a small headroom for compiler internals.
    vmem_cap = _vmem_capacity_bytes()
    vmem_limit = int(vmem_cap * 3 // 4)
    tile_budget = max(vmem_limit - (8 << 20), vmem_limit // 2)

    num_cores = _num_tensorcores()
    if tile_m is None:
        tile_m, steps = _choose_tiling(B, Din, Hpad, Dpad, w_bytes, out_bytes,
                                       tile_budget, num_cores)
    else:
        steps = pl.cdiv(B, tile_m)
    # Blocked (non-full) batch tiles must respect the narrowest blocked dtype's
    # sublane multiple: x is f32 (8); the out tile needs 16 if out_dtype=bf16.
    sub = 16 if (out_bytes == 2) else 8
    assert tile_m == B or tile_m % sub == 0, (
        f"tile_m must equal B or be a multiple of {sub}")

    # Only pad the batch if the chosen tiling really needs it (auto tiling with
    # B % num_cores == 0 never does).
    B_pad = tile_m * steps
    if B_pad != B:
        # TODO(synk): replace with a when-guarded ragged tail tile to avoid the
        # extra HBM pass over x when B is large and not tileable evenly.
        x = jnp.pad(x, ((0, B_pad - B), (0, 0)))

    # x stays f32 in HBM (cast happens in-kernel). Weights are tiny; cast once.
    w1 = w1.astype(matmul_dtype)
    w2 = w2.astype(matmul_dtype)
    b1 = b1.astype(jnp.float32)
    b2 = b2.astype(jnp.float32)

    grid = (steps,)
    flops = 2 * B_pad * (Din * Hpad + Hpad * Dpad)
    bytes_accessed = (B_pad * Din * 4 + Din * Hpad * w_bytes
                      + Hpad * Dpad * w_bytes + Hpad * 4 + Dpad * 4
                      + B_pad * Dpad * out_bytes)

    out = pl.pallas_call(
        mlp_kernel,
        out_shape=jax.ShapeDtypeStruct((B_pad, Dpad), out_dtype),
        grid_spec=pltpu.PrefetchScalarGridSpec(
            num_scalar_prefetch=0,
            grid=grid,
            in_specs=[
                pl.BlockSpec((tile_m, Din), lambda i: (i, 0)),  # x tile (pipelined, f32)
                pl.BlockSpec((Din, Hpad),   lambda i: (0, 0)),  # w1 (resident)
                pl.BlockSpec((1, Hpad),     lambda i: (0, 0)),  # b1
                pl.BlockSpec((Hpad, Dpad),  lambda i: (0, 0)),  # w2 (resident, lane-padded)
                pl.BlockSpec((1, Dpad),     lambda i: (0, 0)),  # b2
            ],
            out_specs=pl.BlockSpec((tile_m, Dpad), lambda i: (i, 0)),
        ),
        compiler_params=pltpu.CompilerParams(
            dimension_semantics=("parallel",),
            vmem_limit_bytes=vmem_limit,
        ),
        cost_estimate=pl.CostEstimate(
            flops=flops, transcendentals=0, bytes_accessed=bytes_accessed),
    )(x, w1, b1, w2, b2)

    if B_pad == B and Dpad == Dout:
        return out
    # TODO(synk): return the padded buffer and slice lazily in the consumer to
    # save this extra copy kernel when callers can tolerate padded outputs.
    return out[:B, :Dout]


def init_ournet_params(key, input_dim, output_dim, width, eps=0.01):
    """Deterministic synthetic init mirroring ournet.__init__ (depth=2).

    Hidden layer : weight = randn * eps, bias = zeros
    Final layer  : weight = randn * eps, bias = PyTorch default uniform
    Weights are returned already transposed to [in, out].
    """
    k1, k2, k3 = jax.random.split(key, 3)
    # PyTorch weight shape is (out, in); generate that then transpose.
    w1_pt = jax.random.normal(k1, (width, input_dim), jnp.float32) * eps
    b1 = jnp.zeros((1, width), jnp.float32)
    w2_pt = jax.random.normal(k2, (output_dim, width), jnp.float32) * eps
    bound = 1.0 / jnp.sqrt(jnp.float32(width))
    b2 = jax.random.uniform(k3, (1, output_dim), jnp.float32, -bound, bound)
    return w1_pt.T, b1, w2_pt.T, b2


def ournet_forward_ref(x, w1, b1, w2, b2):
    h = jnp.maximum(x @ w1 + b1, 0.0)
    return h @ w2 + b2


if __name__ == "__main__":
    # Small shapes consistent with the module: input_dim=32, depth=2 with
    # width(hidden)=64, output_dim=16, batch=256. Tiling is auto-selected:
    # grid=(1,) on single-TC chips, grid=(2,) (tile_m=128) on dual-TC chips.
    B, Din, H, Dout = 256, 32, 64, 16
    eps = 0.01

    key = jax.random.PRNGKey(0)
    kx, kp = jax.random.split(key)
    x = jax.random.normal(kx, (B, Din), jnp.float32)
    w1, b1, w2, b2 = init_ournet_params(kp, Din, Dout, H, eps=eps)

    matmul_dtype = _default_matmul_dtype()
    out = ournet_forward(x, w1, b1, w2, b2, matmul_dtype=matmul_dtype)
    out = jax.block_until_ready(out)

    ref = ournet_forward_ref(x, w1, b1, w2, b2)
    assert out.shape == (B, Dout)
    if matmul_dtype == jnp.float32:
        atol, rtol = 1e-5, 1e-5
    else:  # bf16 MXU inputs, f32 accumulation
        atol, rtol = 2e-3, 2e-2
    assert jnp.allclose(out, ref, atol=atol, rtol=rtol), "mismatch vs reference"

    print("KERNEL_OK")
</pallas_src>

<mosaic_0001>
module attributes {stable_mosaic.version = 11 : i64} {
  func.func @mlp_kernel(%arg0: i32, %arg1: memref<256x32xf32, #tpu.memory_space<vmem>>, %arg2: memref<32x128xf32, #tpu.memory_space<vmem>>, %arg3: memref<1x128xf32, #tpu.memory_space<vmem>>, %arg4: memref<128x128xf32, #tpu.memory_space<vmem>>, %arg5: memref<1x128xf32, #tpu.memory_space<vmem>>, %arg6: memref<256x128xf32, #tpu.memory_space<vmem>>) attributes {dimension_semantics = [#tpu.dimension_semantics<parallel>], iteration_bounds = array<i64: 1>, scalar_prefetch = 0 : i64, scratch_operands = 0 : i64, tpu.core_type = #tpu.core_type<tc>, window_params = [{transform_indices = @transform_0, window_bounds = array<i64: 256, 32>}, {pipeline_mode = #tpu.pipeline_mode<synchronous>, transform_indices = @transform_1, window_bounds = array<i64: 32, 128>}, {pipeline_mode = #tpu.pipeline_mode<synchronous>, transform_indices = @transform_2, window_bounds = array<i64: 1, 128>}, {pipeline_mode = #tpu.pipeline_mode<synchronous>, transform_indices = @transform_3, window_bounds = array<i64: 128, 128>}, {pipeline_mode = #tpu.pipeline_mode<synchronous>, transform_indices = @transform_4, window_bounds = array<i64: 1, 128>}, {transform_indices = @transform_5, window_bounds = array<i64: 256, 128>}]} {
    %c0 = arith.constant 0 : index
    %c0_0 = arith.constant 0 : index
    %0 = vector.load %arg1[%c0, %c0_0] : memref<256x32xf32, #tpu.memory_space<vmem>>, vector<256x32xf32>
    %c0_1 = arith.constant 0 : index
    %c0_2 = arith.constant 0 : index
    %1 = vector.load %arg2[%c0_1, %c0_2] : memref<32x128xf32, #tpu.memory_space<vmem>>, vector<32x128xf32>
    %cst = arith.constant dense<0.000000e+00> : vector<256x128xf32>
    %2 = tpu.matmul %0, %1, %cst {dimension_numbers = #tpu.dot_dimension_numbers<[1], [0], [0], [1], [0, 0, 1, 1], [], []>} : vector<256x32xf32>, vector<32x128xf32>, vector<256x128xf32> -> vector<256x128xf32>
    %c0_3 = arith.constant 0 : index
    %c0_4 = arith.constant 0 : index
    %3 = vector.load %arg3[%c0_3, %c0_4] : memref<1x128xf32, #tpu.memory_space<vmem>>, vector<1x128xf32>
    %4 = vector.broadcast %3 : vector<1x128xf32> to vector<256x128xf32>
    %5 = arith.addf %2, %4 : vector<256x128xf32>
    %cst_5 = arith.constant 0.000000e+00 : f32
    %6 = vector.broadcast %cst_5 : f32 to vector<256x128xf32>
    %7 = arith.maximumf %5, %6 : vector<256x128xf32>
    %c0_6 = arith.constant 0 : index
    %c0_7 = arith.constant 0 : index
    %8 = vector.load %arg4[%c0_6, %c0_7] : memref<128x128xf32, #tpu.memory_space<vmem>>, vector<128x128xf32>
    %cst_8 = arith.constant dense<0.000000e+00> : vector<256x128xf32>
    %9 = tpu.matmul %7, %8, %cst_8 {dimension_numbers = #tpu.dot_dimension_numbers<[1], [0], [0], [1], [0, 0, 1, 1], [], []>} : vector<256x128xf32>, vector<128x128xf32>, vector<256x128xf32> -> vector<256x128xf32>
    %c0_9 = arith.constant 0 : index
    %c0_10 = arith.constant 0 : index
    %10 = vector.load %arg5[%c0_9, %c0_10] : memref<1x128xf32, #tpu.memory_space<vmem>>, vector<1x128xf32>
    %11 = vector.broadcast %10 : vector<1x128xf32> to vector<256x128xf32>
    %12 = arith.addf %9, %11 : vector<256x128xf32>
    %c0_11 = arith.constant 0 : index
    %c0_12 = arith.constant 0 : index
    %13 = vector.load %arg6[%c0_11, %c0_12] : memref<256x128xf32, #tpu.memory_space<vmem>>, vector<256x128xf32>
    tpu.vector_store %arg6[%c0_11, %c0_12], %12 {strides = array<i32>} : memref<256x128xf32, #tpu.memory_space<vmem>>, vector<256x128xf32>,
    return
  }
  func.func @transform_0(%arg0: i32) -> (i32, i32) {
    %c0_i32 = arith.constant 0 : i32
    %c0_i32_0 = arith.constant 0 : i32
    return %arg0, %c0_i32 : i32, i32
  }
  func.func @transform_1(%arg0: i32) -> (i32, i32) {
    %c0_i32 = arith.constant 0 : i32
    %c0_i32_0 = arith.constant 0 : i32
    %c0_i32_1 = arith.constant 0 : i32
    return %c0_i32, %c0_i32_0 : i32, i32
  }
  func.func @transform_2(%arg0: i32) -> (i32, i32) {
    %c0_i32 = arith.constant 0 : i32
    %c0_i32_0 = arith.constant 0 : i32
    %c0_i32_1 = arith.constant 0 : i32
    return %c0_i32, %c0_i32_0 : i32, i32
  }
  func.func @transform_3(%arg0: i32) -> (i32, i32) {
    %c0_i32 = arith.constant 0 : i32
    %c0_i32_0 = arith.constant 0 : i32
    %c0_i32_1 = arith.constant 0 : i32
    return %c0_i32, %c0_i32_0 : i32, i32
  }
  func.func @transform_4(%arg0: i32) -> (i32, i32) {
    %c0_i32 = arith.constant 0 : i32
    %c0_i32_0 = arith.constant 0 : i32
    %c0_i32_1 = arith.constant 0 : i32
    return %c0_i32, %c0_i32_0 : i32, i32
  }
  func.func @transform_5(%arg0: i32) -> (i32, i32) {
    %c0_i32 = arith.constant 0 : i32
    %c0_i32_0 = arith.constant 0 : i32
    return %arg0, %c0_i32 : i32, i32
  }
}

</mosaic_0001>

<bundles_post_ra>
// kernel: tpu_custom_call.1
= control target key start
LH: loop header
LB: loop body
LE: loop exit
PB: predicated region body
PF: predicated region fallthrough
CT: control target
= control target key end

     0   :  { %s883_s0 = inlined_call_operand.vmem [shape: f32[256,32], index: 0, kind: input, shape index: {}]   ;;  %s884_s1 = inlined_call_operand.vmem [shape: f32[32,128], index: 1, kind: input, shape index: {}]   ;;  %s885_s2 = inlined_call_operand.vmem [shape: f32[1,128], index: 2, kind: input, shape index: {}]   ;;  %s886_s3 = inlined_call_operand.vmem [shape: f32[128,128], index: 3, kind: input, shape index: {}]   ;;  %s887_s4 = inlined_call_operand.vmem [shape: f32[1,128], index: 4, kind: input, shape index: {}]   ;;  %s888_s5 = inlined_call_operand.hbm [shape: f32[256,128], index: 5, kind: output, shape index: {}]  }
   0x1   :  { %v56_v0 = vld [vmem:[%s884_s1 + $0x18] sm:$0xff]  ;;  %v55_v1 = vld [vmem:[%s884_s1 + $0x10] sm:$0xff]  ;;  %v54_v2 = vld [vmem:[%s884_s1 + $0x8] sm:$0xff] }
   0x2   :  { %170 = vmatpush.msra.mxu0 %v56_v0  ;;  %518 = vmatpush.msra.mxu3 %v56_v0 }
   0x4   :  { %171 = vmatpush.msra.mxu0 %v55_v1  ;;  %519 = vmatpush.msra.mxu3 %v55_v1 }
   0x5   :  { %10 = vsyncpa [#allocation3], 0  ;;  %v53_v3 = vld [vmem:[%s884_s1] sm:$0xff]  ;;  %vm61_vm0 = vcmask 261120   ;;  %v22_v5 = vld [vmem:[%s883_s0 + $0x8] sm:$0xff]  ;;  %s474_s21 = sshll.u32 %s888_s5, 4  ;;  %s475_s21 = int_to_ptr.hbm [resolvable:$true] %s474_s21 }
   0x6   :  { %172 = vmatpush.msra.mxu0 %v54_v2  ;;  %v21_v4 = vld [vmem:[%s883_s0] sm:$0xff]  ;;  %520 = vmatpush.msra.mxu3 %v54_v2  ;;  %v23_v6 = vld [vmem:[%s883_s0 + $0x10] sm:$0xff]  ;;  %v24_v7 = vld [vmem:[%s883_s0 + $0x18] sm:$0xff]  ;;  %s586_s22 = smov 128   ;;  %s587_s23 = smov 8  }
   0x7   :  { %v25_v8 = vld [vmem:[%s883_s0 + $0x20] sm:$0xff]  ;;  %v26_v9 = vld [vmem:[%s883_s0 + $0x28] sm:$0xff]  ;;  %v27_v10 = vld [vmem:[%s883_s0 + $0x30] sm:$0xff] }
   0x8   :  { %173 = vmatpush.msra.mxu0 %v53_v3  ;;  %521 = vmatpush.msra.mxu3 %v53_v3  ;;  %v28_v11 = vld [vmem:[%s883_s0 + $0x38] sm:$0xff]  ;;  %v29_v12 = vld [vmem:[%s883_s0 + $0x40] sm:$0xff]  ;;  %v317_v14 = vld [vmem:[%s886_s3 + $0x70] sm:$0xff] }
   0x9   :  { %486 = vmatmul.msk.f32.vlgmr.msra.gmra.mxu0 %vm61_vm0, %v21_v4  ;;  %v318_v13 = vld [vmem:[%s886_s3 + $0x78] sm:$0xff]  ;;  %v316_v15 = vld [vmem:[%s886_s3 + $0x68] sm:$0xff]  ;;  %v315_v17 = vld [vmem:[%s886_s3 + $0x60] sm:$0xff] }
   0xa   :  { %323 = vmatpush.msra.mxu1 %v318_v13  ;;  %522 = vmatpush.msra.mxu2 %v318_v13  ;;  %v30_v16 = vld [vmem:[%s883_s0 + $0x48] sm:$0xff]  ;;  %v314_v18 = vld [vmem:[%s886_s3 + $0x58] sm:$0xff]  ;;  %v313_v19 = vld [vmem:[%s886_s3 + $0x50] sm:$0xff] }
   0xb   :  { %523 = vmatpush.msrb.mxu3 %v318_v13  ;;  %v312_v20 = vld [vmem:[%s886_s3 + $0x48] sm:$0xff]  ;;  %v31_v21 = vld [vmem:[%s883_s0 + $0x50] sm:$0xff]  ;;  %v311_v22 = vld [vmem:[%s886_s3 + $0x40] sm:$0xff] }
   0xc   :  { %324 = vmatpush.msra.mxu1 %v317_v14  ;;  %524 = vmatpush.msra.mxu2 %v317_v14  ;;  %v310_v23 = vld [vmem:[%s886_s3 + $0x38] sm:$0xff]  ;;  %v309_v24 = vld [vmem:[%s886_s3 + $0x30] sm:$0xff]  ;;  %v308_v25 = vld [vmem:[%s886_s3 + $0x28] sm:$0xff] }
   0xd   :  { %525 = vmatpush.msrb.mxu3 %v317_v14  ;;  %v32_v26 = vld [vmem:[%s883_s0 + $0x58] sm:$0xff]  ;;  %v307_v27 = vld [vmem:[%s886_s3 + $0x20] sm:$0xff]  ;;  %v39_v28 = vld [vmem:[%s883_s0 + $0x90] sm:$0xff] }
   0xe   :  { %325 = vmatpush.msra.mxu1 %v316_v15  ;;  %526 = vmatpush.msra.mxu2 %v316_v15  ;;  %v306_v29 = vld [vmem:[%s886_s3 + $0x18] sm:$0xff]  ;;  %v305_v30 = vld [vmem:[%s886_s3 + $0x10] sm:$0xff]  ;;  %v33_v31 = vld [vmem:[%s883_s0 + $0x60] sm:$0xff] }
   0xf   :  { %527 = vmatpush.msrb.mxu3 %v316_v15  ;;  %v304_v32 = vld [vmem:[%s886_s3 + $0x8] sm:$0xff]  ;;  %v303_v33 = vld [vmem:[%s886_s3] sm:$0xff]  ;;  %v40_v34 = vld [vmem:[%s883_s0 + $0x98] sm:$0xff] }
  0x10   :  { %326 = vmatpush.msra.mxu1 %v315_v17  ;;  %528 = vmatpush.msra.mxu2 %v315_v17  ;;  %v34_v35 = vld [vmem:[%s883_s0 + $0x68] sm:$0xff]  ;;  %v41_v36 = vld [vmem:[%s883_s0 + $0xa0] sm:$0xff]  ;;  %v35_v37 = vld [vmem:[%s883_s0 + $0x70] sm:$0xff] }
  0x11   :  { %487 = vmatmul.msk.f32.gmra.mxu0 %vm61_vm0, %v22_v5  ;;  %529 = vmatpush.msrb.mxu3 %v315_v17  ;;  %v42_v38 = vld [vmem:[%s883_s0 + $0xa8] sm:$0xff]  ;;  %v36_v39 = vld [vmem:[%s883_s0 + $0x78] sm:$0xff]  ;;  %v43_v40 = vld [vmem:[%s883_s0 + $0xb0] sm:$0xff] }
  0x12   :  { %327 = vmatpush.msra.mxu1 %v314_v18  ;;  %530 = vmatpush.msra.mxu2 %v314_v18  ;;  %v765_v41 = vld [vmem:[%s885_s2] ss:$0 sm:$0xff]  ;;  %v44_v46 = vld [vmem:[%s883_s0 + $0xb8] sm:$0xff]  ;;  %v38_v48 = vld [vmem:[%s883_s0 + $0x88] sm:$0xff] }
  0x13   :  { %531 = vmatpush.msrb.mxu3 %v314_v18  ;;  %v37_v43 = vld [vmem:[%s883_s0 + $0x80] sm:$0xff]  ;;  %v46_v55 = vld [vmem:[%s883_s0 + $0xc8] sm:$0xff]  ;;  %v47_v59 = vld [vmem:[%s883_s0 + $0xd0] sm:$0xff] }
  0x14   :  { %328 = vmatpush.msra.mxu1 %v313_v19  ;;  %532 = vmatpush.msra.mxu2 %v313_v19  ;;  %v45_v51 = vld [vmem:[%s883_s0 + $0xc0] sm:$0xff]  ;;  %v48_v63 = vld [vmem:[%s883_s0 + $0xd8] sm:$0xff] }
  0x15   :  { %533 = vmatpush.msrb.mxu3 %v313_v19  ;;  %v49_v3 = vld [vmem:[%s883_s0 + $0xe0] sm:$0xff]  ;;  %v52_v15 = vld [vmem:[%s883_s0 + $0xf8] sm:$0xff] }
  0x16   :  { %329 = vmatpush.msra.mxu1 %v312_v20  ;;  %534 = vmatpush.msra.mxu2 %v312_v20 }
  0x17   :  { %535 = vmatpush.msrb.mxu3 %v312_v20 }
  0x18   :  { %330 = vmatpush.msra.mxu1 %v311_v22  ;;  %536 = vmatpush.msra.mxu2 %v311_v22 }
  0x19   :  { %488 = vmatmul.msk.f32.gmra.mxu0 %vm61_vm0, %v23_v6  ;;  %537 = vmatpush.msrb.mxu3 %v311_v22 }
  0x1a   :  { %331 = vmatpush.msra.mxu1 %v310_v23  ;;  %538 = vmatpush.msra.mxu2 %v310_v23 }
  0x1b   :  { %539 = vmatpush.msrb.mxu3 %v310_v23 }
  0x1c   :  { %332 = vmatpush.msra.mxu1 %v309_v24  ;;  %540 = vmatpush.msra.mxu2 %v309_v24 }
  0x1d   :  { %541 = vmatpush.msrb.mxu3 %v309_v24 }
  0x1e   :  { %333 = vmatpush.msra.mxu1 %v308_v25  ;;  %542 = vmatpush.msra.mxu2 %v308_v25 }
  0x1f   :  { %543 = vmatpush.msrb.mxu3 %v308_v25 }
  0x20   :  { %334 = vmatpush.msra.mxu1 %v307_v27  ;;  %504 = vmatmul.msk.f32.vlgmr.msra.gmra.mxu3 %vm61_vm0, %v39_v28 }
  0x21   :  { %489 = vmatmul.msk.f32.gmra.mxu0 %vm61_vm0, %v24_v7  ;;  %544 = vmatpush.msra.mxu2 %v307_v27  ;;  %v50_v7 = vld [vmem:[%s883_s0 + $0xe8] sm:$0xff] }
  0x22   :  { %545 = vmatpush.msrb.mxu3 %v307_v27  ;;  %335 = vmatpush.msra.mxu1 %v306_v29 }
  0x23   :  { %546 = vmatpush.msra.mxu2 %v306_v29 }
  0x24   :  { %547 = vmatpush.msrb.mxu3 %v306_v29  ;;  %336 = vmatpush.msra.mxu1 %v305_v30 }
  0x25   :  { %548 = vmatpush.msra.mxu2 %v305_v30 }
  0x26   :  { %549 = vmatpush.msrb.mxu3 %v305_v30  ;;  %337 = vmatpush.msra.mxu1 %v304_v32 }
  0x27   :  { %550 = vmatpush.msra.mxu2 %v304_v32 }
  0x28   :  { %338 = vmatpush.msra.mxu1 %v303_v33  ;;  %505 = vmatmul.msk.f32.gmra.mxu3 %vm61_vm0, %v40_v34 }
  0x29   :  { %490 = vmatmul.msk.f32.gmra.mxu0 %vm61_vm0, %v25_v8  ;;  %552 = vmatpush.msra.mxu2 %v303_v33 }
  0x2a   :  { %551 = vmatpush.msrb.mxu3 %v304_v32 }
  0x2c   :  { %553 = vmatpush.msrb.mxu3 %v303_v33 }
  0x30   :  { %506 = vmatmul.msk.f32.gmra.mxu3 %vm61_vm0, %v41_v36 }
  0x31   :  { %491 = vmatmul.msk.f32.gmra.mxu0 %vm61_vm0, %v26_v9 }
  0x38   :  { %507 = vmatmul.msk.f32.gmra.mxu3 %vm61_vm0, %v42_v38 }
  0x39   :  { %492 = vmatmul.msk.f32.gmra.mxu0 %vm61_vm0, %v27_v10 }
  0x40   :  { %508 = vmatmul.msk.f32.gmra.mxu3 %vm61_vm0, %v43_v40 }
  0x41   :  { %493 = vmatmul.msk.f32.gmra.mxu0 %vm61_vm0, %v28_v11  ;;  %v51_v11 = vld [vmem:[%s883_s0 + $0xf0] sm:$0xff] }
  0x48   :  { %509 = vmatmul.msk.f32.gmra.mxu3 %vm61_vm0, %v44_v46 }
  0x49   :  { %494 = vmatmul.msk.f32.gmra.mxu0 %vm61_vm0, %v29_v12 }
  0x50   :  { %510 = vmatmul.msk.f32.gmra.mxu3 %vm61_vm0, %v45_v51 }
  0x51   :  { %495 = vmatmul.msk.f32.gmra.mxu0 %vm61_vm0, %v30_v16 }
  0x58   :  { %511 = vmatmul.msk.f32.gmra.mxu3 %vm61_vm0, %v46_v55 }
  0x59   :  { %496 = vmatmul.msk.f32.gmra.mxu0 %vm61_vm0, %v31_v21 }
  0x60   :  { %512 = vmatmul.msk.f32.gmra.mxu3 %vm61_vm0, %v47_v59 }
  0x61   :  { %497 = vmatmul.msk.f32.gmra.mxu0 %vm61_vm0, %v32_v26 }
  0x68   :  { %513 = vmatmul.msk.f32.gmra.mxu3 %vm61_vm0, %v48_v63 }
  0x69   :  { %498 = vmatmul.msk.f32.gmra.mxu0 %vm61_vm0, %v33_v31 }
  0x70   :  { %514 = vmatmul.msk.f32.gmra.mxu3 %vm61_vm0, %v49_v3 }
  0x71   :  { %499 = vmatmul.msk.f32.gmra.mxu0 %vm61_vm0, %v34_v35 }
  0x78   :  { %515 = vmatmul.msk.f32.gmra.mxu3 %vm61_vm0, %v50_v7 }
  0x79   :  { %500 = vmatmul.msk.f32.gmra.mxu0 %vm61_vm0, %v35_v37 }
  0x80   :  { %516 = vmatmul.msk.f32.gmra.mxu3 %vm61_vm0, %v51_v11 }
  0x81   :  { %501 = vmatmul.msk.f32.gmra.mxu0 %vm61_vm0, %v36_v39 }
  0x86   :  { %v175_v42 = vpop.f32.mrf.mxu0 }
  0x87   :  { %v176_v44 = vadd.f32 %v765_v41, %v175_v42  ;;  %v830_v42 = vld [vmem:[%s887_s4] ss:$0 sm:$0xff]  ;;  %s585_s4 = smov [#allocation2]  }
  0x88   :  { %517 = vmatmul.msk.f32.gmra.mxu3 %vm61_vm0, %v52_v15  ;;  %s472_s18 = sshll.u32 %s585_s4, 4  ;;  %s473_s18 = int_to_ptr.vmem [resolvable:$true] %s472_s18 }
  0x89   :  { %v271_v45 = vmax.f32 %v176_v44, 0.0  ;;  %502 = vmatmul.msk.f32.gmra.mxu0 %vm61_vm0, %v37_v43 }
  0x8b   :  { %339 = vmatmul.f32.vlgmr.msra.gmra.mxu1 %v271_v45 }
  0x8e   :  { %v178_v47 = vpop.f32.mrf.mxu0 }
  0x8f   :  { %v179_v49 = vadd.f32 %v765_v41, %v178_v47 }
  0x91   :  { %v272_v50 = vmax.f32 %v179_v49, 0.0  ;;  %503 = vmatmul.msk.f32.gmra.mxu0 %vm61_vm0, %v38_v48 }
  0x93   :  { %342 = vmatmul.f32.gmra.mxu1 %v272_v50 }
  0x96   :  { %v181_v52 = vpop.f32.mrf.mxu0 }
  0x97   :  { %v182_v53 = vadd.f32 %v765_v41, %v181_v52 }
  0x99   :  { %v273_v54 = vmax.f32 %v182_v53, 0.0 }
  0x9b   :  { %345 = vmatmul.f32.gmra.mxu1 %v273_v54 }
  0x9e   :  { %v184_v56 = vpop.f32.mrf.mxu0 }
  0x9f   :  { %v185_v57 = vadd.f32 %v765_v41, %v184_v56 }
  0xa1   :  { %v274_v58 = vmax.f32 %v185_v57, 0.0 }
  0xa3   :  { %348 = vmatmul.f32.gmra.mxu1 %v274_v58  ;;  %v229_v26 = vpop.f32.mrf.mxu3 }
  0xa4   :  { %v230_v55 = vadd.f32 %v765_v41, %v229_v26 }
  0xa6   :  { %v187_v60 = vpop.f32.mrf.mxu0  ;;  %v289_v58 = vmax.f32 %v230_v55, 0.0 }
  0xa7   :  { %v188_v61 = vadd.f32 %v765_v41, %v187_v60 }
  0xa9   :  { %v275_v62 = vmax.f32 %v188_v61, 0.0 }
  0xab   :  { %351 = vmatmul.f32.gmra.mxu1 %v275_v62  ;;  %v232_v30 = vpop.f32.mrf.mxu3 }
  0xac   :  { %v233_v60 = vadd.f32 %v765_v41, %v232_v30 }
  0xae   :  { %v190_v0 = vpop.f32.mrf.mxu0  ;;  %v290_v63 = vmax.f32 %v233_v60, 0.0 }
  0xaf   :  { %v191_v1 = vadd.f32 %v765_v41, %v190_v0 }
  0xb1   :  { %v276_v2 = vmax.f32 %v191_v1, 0.0 }
  0xb3   :  { %354 = vmatmul.f32.gmra.mxu1 %v276_v2  ;;  %v235_v34 = vpop.f32.mrf.mxu3 }
  0xb4   :  { %v236_v1 = vadd.f32 %v765_v41, %v235_v34 }
  0xb6   :  { %v193_v4 = vpop.f32.mrf.mxu0 }
  0xb7   :  { %v194_v5 = vadd.f32 %v765_v41, %v193_v4  ;;  %v291_v4 = vmax.f32 %v236_v1, 0.0 }
  0xb9   :  { %v277_v6 = vmax.f32 %v194_v5, 0.0 }
  0xbb   :  { %357 = vmatmul.f32.gmra.mxu1 %v277_v6  ;;  %v238_v38 = vpop.f32.mrf.mxu3 }
  0xbc   :  { %v239_v6 = vadd.f32 %v765_v41, %v238_v38 }
  0xbe   :  { %v196_v8 = vpop.f32.mrf.mxu0 }
  0xbf   :  { %v197_v9 = vadd.f32 %v765_v41, %v196_v8 }
  0xc1   :  { %v278_v10 = vmax.f32 %v197_v9, 0.0  ;;  %v292_v9 = vmax.f32 %v239_v6, 0.0 }
  0xc3   :  { %360 = vmatmul.f32.gmra.mxu1 %v278_v10  ;;  %v241_v44 = vpop.f32.mrf.mxu3 }
  0xc4   :  { %v242_v11 = vadd.f32 %v765_v41, %v241_v44 }
  0xc6   :  { %v199_v12 = vpop.f32.mrf.mxu0 }
  0xc7   :  { %v200_v13 = vadd.f32 %v765_v41, %v199_v12 }
  0xc9   :  { %v279_v14 = vmax.f32 %v200_v13, 0.0 }
  0xcb   :  { %363 = vmatmul.f32.gmra.mxu1 %v279_v14  ;;  %v244_v50 = vpop.f32.mrf.mxu3  ;;  %v293_v14 = vmax.f32 %v242_v11, 0.0 }
  0xce   :  { %v202_v16 = vpop.f32.mrf.mxu0 }
  0xcf   :  { %v203_v17 = vadd.f32 %v765_v41, %v202_v16  ;;  %v245_v16 = vadd.f32 %v765_v41, %v244_v50 }
  0xd1   :  { %v280_v18 = vmax.f32 %v203_v17, 0.0 }
  0xd3   :  { %366 = vmatmul.f32.gmra.mxu1 %v280_v18  ;;  %v247_v56 = vpop.f32.mrf.mxu3 }
  0xd6   :  { %v205_v19 = vpop.f32.mrf.mxu0 }
  0xd7   :  { %v206_v20 = vadd.f32 %v765_v41, %v205_v19  ;;  %v294_v19 = vmax.f32 %v245_v16, 0.0 }
  0xd9   :  { %v281_v21 = vmax.f32 %v206_v20, 0.0 }
  0xdb   :  { %369 = vmatmul.f32.gmra.mxu1 %v281_v21  ;;  %v250_v61 = vpop.f32.mrf.mxu3  ;;  %v248_v21 = vadd.f32 %v765_v41, %v247_v56 }
  0xde   :  { %v208_v22 = vpop.f32.mrf.mxu0 }
  0xdf   :  { %v209_v23 = vadd.f32 %v765_v41, %v208_v22 }
  0xe1   :  { %v282_v24 = vmax.f32 %v209_v23, 0.0 }
  0xe3   :  { %372 = vmatmul.f32.gmra.mxu1 %v282_v24  ;;  %v253_v2 = vpop.f32.mrf.mxu3 }
  0xe6   :  { %v211_v25 = vpop.f32.mrf.mxu0 }
  0xe7   :  { %v212_v27 = vadd.f32 %v765_v41, %v211_v25  ;;  %v295_v25 = vmax.f32 %v248_v21, 0.0 }
  0xe9   :  { %v283_v28 = vmax.f32 %v212_v27, 0.0 }
  0xeb   :  { %375 = vmatmul.f32.gmra.mxu1 %v283_v28  ;;  %v256_v7 = vpop.f32.mrf.mxu3  ;;  %v251_v28 = vadd.f32 %v765_v41, %v250_v61 }
  0xee   :  { %v214_v29 = vpop.f32.mrf.mxu0 }
  0xef   :  { %v215_v31 = vadd.f32 %v765_v41, %v214_v29 }
  0xf1   :  { %v284_v32 = vmax.f32 %v215_v31, 0.0 }
  0xf3   :  { %378 = vmatmul.f32.gmra.mxu1 %v284_v32  ;;  %v259_v12 = vpop.f32.mrf.mxu3  ;;  %v296_v32 = vmax.f32 %v251_v28, 0.0 }
  0xf6   :  { %v217_v33 = vpop.f32.mrf.mxu0 }
  0xf7   :  { %v218_v35 = vadd.f32 %v765_v41, %v217_v33 }
  0xf9   :  { %v285_v36 = vmax.f32 %v218_v35, 0.0  ;;  %v254_v35 = vadd.f32 %v765_v41, %v253_v2 }
  0xfb   :  { %381 = vmatmul.f32.gmra.mxu1 %v285_v36  ;;  %v262_v17 = vpop.f32.mrf.mxu3 }
  0xfe   :  { %v220_v37 = vpop.f32.mrf.mxu0 }
  0xff   :  { %v221_v39 = vadd.f32 %v765_v41, %v220_v37  ;;  %v297_v37 = vmax.f32 %v254_v35, 0.0 }
 0x101   :  { %v286_v40 = vmax.f32 %v221_v39, 0.0  ;;  %v257_v39 = vadd.f32 %v765_v41, %v256_v7 }
 0x103   :  { %384 = vmatmul.f32.vlgmr.msra.gmra.mxu2 %v286_v40  ;;  %v265_v22 = vpop.f32.mrf.mxu3 }
 0x104   :  { %v266_v23 = vadd.f32 %v765_v41, %v265_v22 }
 0x106   :  { %v223_v43 = vpop.f32.mrf.mxu0  ;;  %v301_v27 = vmax.f32 %v266_v23, 0.0 }
 0x107   :  { %v224_v45 = vadd.f32 %v765_v41, %v223_v43  ;;  %v298_v43 = vmax.f32 %v257_v39, 0.0 }
 0x108   :  { %v340_v46 = vpop.f32.mrf.mxu1  ;;  %429 = vmatmul.f32.vlgmr.msrb.gmra.mxu3 %v301_v27 }
 0x109   :  { %v287_v47 = vmax.f32 %v224_v45, 0.0  ;;  %v341_v48 = vadd.f32 %v830_v42, %v340_v46  ;;  %v260_v45 = vadd.f32 %v765_v41, %v259_v12 }
 0x10b   :  { %436 = vst [vmem:[#allocation2] sm:$0xff] %v341_v48  ;;  %387 = vmatmul.f32.gmra.mxu2 %v287_v47  ;;  %v268_v29 = vpop.f32.mrf.mxu3  ;;  %v299_v47 = vmax.f32 %v260_v45, 0.0 }
 0x10c   :  { %v269_v30 = vadd.f32 %v765_v41, %v268_v29 }
 0x10e   :  { %v226_v49 = vpop.f32.mrf.mxu0  ;;  %v302_v34 = vmax.f32 %v269_v30, 0.0 }
 0x10f   :  { %v227_v51 = vadd.f32 %v765_v41, %v226_v49  ;;  %v263_v49 = vadd.f32 %v765_v41, %v262_v17 }
 0x110   :  { %v343_v52 = vpop.f32.mrf.mxu1  ;;  %432 = vmatmul.f32.gmra.mxu3 %v302_v34 }
 0x111   :  { %v288_v53 = vmax.f32 %v227_v51, 0.0  ;;  %v344_v54 = vadd.f32 %v830_v42, %v343_v52  ;;  %v300_v51 = vmax.f32 %v263_v49, 0.0 }
 0x113   :  { %437 = vst [vmem:[#allocation2 + $0x8] sm:$0xff] %v344_v54  ;;  %390 = vmatmul.f32.gmra.mxu2 %v288_v53 }
 0x118   :  { %v346_v57 = vpop.f32.mrf.mxu1 }
 0x119   :  { %v347_v59 = vadd.f32 %v830_v42, %v346_v57 }
 0x11b   :  { %438 = vst [vmem:[#allocation2 + $0x10] sm:$0xff] %v347_v59  ;;  %393 = vmatmul.f32.gmra.mxu2 %v289_v58 }
 0x120   :  { %v349_v62 = vpop.f32.mrf.mxu1 }
 0x121   :  { %v350_v0 = vadd.f32 %v830_v42, %v349_v62 }
 0x123   :  { %439 = vst [vmem:[#allocation2 + $0x18] sm:$0xff] %v350_v0  ;;  %396 = vmatmul.f32.gmra.mxu2 %v290_v63 }
 0x128   :  { %v352_v3 = vpop.f32.mrf.mxu1 }
 0x129   :  { %v353_v5 = vadd.f32 %v830_v42, %v352_v3 }
 0x12b   :  { %440 = vst [vmem:[#allocation2 + $0x20] sm:$0xff] %v353_v5  ;;  %399 = vmatmul.f32.gmra.mxu2 %v291_v4 }
 0x130   :  { %v355_v8 = vpop.f32.mrf.mxu1 }
 0x131   :  { %v356_v10 = vadd.f32 %v830_v42, %v355_v8 }
 0x133   :  { %441 = vst [vmem:[#allocation2 + $0x28] sm:$0xff] %v356_v10  ;;  %402 = vmatmul.f32.gmra.mxu2 %v292_v9 }
 0x138   :  { %v358_v13 = vpop.f32.mrf.mxu1 }
 0x139   :  { %v359_v15 = vadd.f32 %v830_v42, %v358_v13 }
 0x13b   :  { %442 = vst [vmem:[#allocation2 + $0x30] sm:$0xff] %v359_v15  ;;  %405 = vmatmul.f32.gmra.mxu2 %v293_v14 }
 0x140   :  { %v361_v18 = vpop.f32.mrf.mxu1 }
 0x141   :  { %v362_v20 = vadd.f32 %v830_v42, %v361_v18 }
 0x143   :  { %443 = vst [vmem:[#allocation2 + $0x38] sm:$0xff] %v362_v20  ;;  %408 = vmatmul.f32.gmra.mxu2 %v294_v19 }
 0x148   :  { %v364_v24 = vpop.f32.mrf.mxu1 }
 0x149   :  { %v365_v26 = vadd.f32 %v830_v42, %v364_v24 }
 0x14b   :  { %444 = vst [vmem:[#allocation2 + $0x40] sm:$0xff] %v365_v26  ;;  %411 = vmatmul.f32.gmra.mxu2 %v295_v25 }
 0x150   :  { %v367_v31 = vpop.f32.mrf.mxu1 }
 0x151   :  { %v368_v33 = vadd.f32 %v830_v42, %v367_v31 }
 0x153   :  { %445 = vst [vmem:[#allocation2 + $0x48] sm:$0xff] %v368_v33  ;;  %414 = vmatmul.f32.gmra.mxu2 %v296_v32 }
 0x158   :  { %v370_v36 = vpop.f32.mrf.mxu1 }
 0x159   :  { %v371_v38 = vadd.f32 %v830_v42, %v370_v36 }
 0x15b   :  { %446 = vst [vmem:[#allocation2 + $0x50] sm:$0xff] %v371_v38  ;;  %417 = vmatmul.f32.gmra.mxu2 %v297_v37 }
 0x160   :  { %v373_v40 = vpop.f32.mrf.mxu1 }
 0x161   :  { %v374_v44 = vadd.f32 %v830_v42, %v373_v40 }
 0x163   :  { %447 = vst [vmem:[#allocation2 + $0x58] sm:$0xff] %v374_v44  ;;  %420 = vmatmul.f32.gmra.mxu2 %v298_v43 }
 0x168   :  { %v376_v46 = vpop.f32.mrf.mxu1 }
 0x169   :  { %v377_v48 = vadd.f32 %v830_v42, %v376_v46 }
 0x16b   :  { %448 = vst [vmem:[#allocation2 + $0x60] sm:$0xff] %v377_v48  ;;  %423 = vmatmul.f32.gmra.mxu2 %v299_v47 }
 0x170   :  { %v379_v50 = vpop.f32.mrf.mxu1 }
 0x171   :  { %v380_v52 = vadd.f32 %v830_v42, %v379_v50 }
 0x173   :  { %449 = vst [vmem:[#allocation2 + $0x68] sm:$0xff] %v380_v52  ;;  %426 = vmatmul.f32.gmra.mxu2 %v300_v51 }
 0x178   :  { %v382_v53 = vpop.f32.mrf.mxu1 }
 0x179   :  { %v383_v54 = vadd.f32 %v830_v42, %v382_v53 }
 0x17b   :  { %450 = vst [vmem:[#allocation2 + $0x70] sm:$0xff] %v383_v54 }
 0x186   :  { %v385_v55 = vpop.f32.mrf.mxu2 }
 0x187   :  { %v386_v56 = vadd.f32 %v830_v42, %v385_v55 }
 0x189   :  { %451 = vst [vmem:[#allocation2 + $0x78] sm:$0xff] %v386_v56 }
 0x18b   :  { %v430_v9 = vpop.f32.mrf.mxu3 }
 0x18c   :  { %v431_v11 = vadd.f32 %v830_v42, %v430_v9 }
 0x18e   :  { %v388_v57 = vpop.f32.mrf.mxu2  ;;  %466 = vst [vmem:[#allocation2 + $0xf0] sm:$0xff] %v431_v11 }
 0x18f   :  { %v389_v58 = vadd.f32 %v830_v42, %v388_v57 }
 0x191   :  { %452 = vst [vmem:[#allocation2 + $0x80] sm:$0xff] %v389_v58 }
 0x193   :  { %v433_v13 = vpop.f32.mrf.mxu3 }
 0x194   :  { %v434_v15 = vadd.f32 %v830_v42, %v433_v13 }
 0x196   :  { %v391_v59 = vpop.f32.mrf.mxu2  ;;  %467 = vst [vmem:[#allocation2 + $0xf8] sm:$0xff] %v434_v15 }
 0x197   :  { %v392_v41 = vadd.f32 %v830_v42, %v391_v59 }
 0x199   :  { %453 = vst [vmem:[#allocation2 + $0x88] sm:$0xff] %v392_v41 }
 0x19e   :  { %v394_v60 = vpop.f32.mrf.mxu2 }
 0x19f   :  { %v395_v61 = vadd.f32 %v830_v42, %v394_v60 }
 0x1a1   :  { %454 = vst [vmem:[#allocation2 + $0x90] sm:$0xff] %v395_v61 }
 0x1a6   :  { %v397_v62 = vpop.f32.mrf.mxu2 }
 0x1a7   :  { %v398_v63 = vadd.f32 %v830_v42, %v397_v62 }
 0x1a9   :  { %455 = vst [vmem:[#allocation2 + $0x98] sm:$0xff] %v398_v63 }
 0x1ae   :  { %v400_v0 = vpop.f32.mrf.mxu2 }
 0x1af   :  { %v401_v1 = vadd.f32 %v830_v42, %v400_v0 }
 0x1b1   :  { %456 = vst [vmem:[#allocation2 + $0xa0] sm:$0xff] %v401_v1 }
 0x1b6   :  { %v403_v2 = vpop.f32.mrf.mxu2 }
 0x1b7   :  { %v404_v3 = vadd.f32 %v830_v42, %v403_v2 }
 0x1b9   :  { %457 = vst [vmem:[#allocation2 + $0xa8] sm:$0xff] %v404_v3 }
 0x1be   :  { %v406_v4 = vpop.f32.mrf.mxu2 }
 0x1bf   :  { %v407_v5 = vadd.f32 %v830_v42, %v406_v4 }
 0x1c1   :  { %458 = vst [vmem:[#allocation2 + $0xb0] sm:$0xff] %v407_v5 }
 0x1c6   :  { %v409_v6 = vpop.f32.mrf.mxu2 }
 0x1c7   :  { %v410_v7 = vadd.f32 %v830_v42, %v409_v6 }
 0x1c9   :  { %459 = vst [vmem:[#allocation2 + $0xb8] sm:$0xff] %v410_v7 }
 0x1ce   :  { %v412_v8 = vpop.f32.mrf.mxu2 }
 0x1cf   :  { %v413_v10 = vadd.f32 %v830_v42, %v412_v8 }
 0x1d1   :  { %460 = vst [vmem:[#allocation2 + $0xc0] sm:$0xff] %v413_v10 }
 0x1d6   :  { %v415_v12 = vpop.f32.mrf.mxu2 }
 0x1d7   :  { %v416_v14 = vadd.f32 %v830_v42, %v415_v12 }
 0x1d9   :  { %461 = vst [vmem:[#allocation2 + $0xc8] sm:$0xff] %v416_v14 }
 0x1de   :  { %v418_v16 = vpop.f32.mrf.mxu2 }
 0x1df   :  { %v419_v17 = vadd.f32 %v830_v42, %v418_v16 }
 0x1e1   :  { %462 = vst [vmem:[#allocation2 + $0xd0] sm:$0xff] %v419_v17 }
 0x1e6   :  { %v421_v18 = vpop.f32.mrf.mxu2 }
 0x1e7   :  { %v422_v19 = vadd.f32 %v830_v42, %v421_v18 }
 0x1e9   :  { %463 = vst [vmem:[#allocation2 + $0xd8] sm:$0xff] %v422_v19 }
 0x1ee   :  { %v424_v20 = vpop.f32.mrf.mxu2 }
 0x1ef   :  { %v425_v21 = vadd.f32 %v830_v42, %v424_v20 }
 0x1f1   :  { %464 = vst [vmem:[#allocation2 + $0xe0] sm:$0xff] %v425_v21 }
 0x1f6   :  { %v427_v22 = vpop.f32.mrf.mxu2 }
 0x1f7   :  { %v428_v23 = vadd.f32 %v830_v42, %v427_v22 }
 0x1f9   :  { %465 = vst [vmem:[#allocation2 + $0xe8] sm:$0xff] %v428_v23 }
 0x1fa   :  { %480 = dma.vmem_to_hbm [thread:$0]  %s473_s18, 4096, %s475_s21, [#allocation3], %s586_s22, %s586_s22, %s587_s23  }
 0x1fb   :  { %583 = dma.done.wait [#allocation3], 4096  }
 0x1fc   :  { %584 = vsyncadd [#allocation3], 4294963200 }
 0x1fd   :  { %485 = vsyncpa [#allocation3], 1 }

</bundles_post_ra>
